<compile_context>
chip_gen: v7x
topology: tpu7x:2x2x1
jax: 0.10.0
libtpu: 0.0.40
codegen_flags: <defaults>
</compile_context>

<pallas_src>
import functools

import jax
import jax.numpy as jnp
from jax.experimental import pallas as pl
from jax.experimental.pallas import tpu as pltpu


# ----------------------------- Pallas kernel ------------------------------ #
def _double_q_kernel(obs_ref, act_ref,
                     w1o_ref, w1a_ref, b1_ref,
                     w2_ref, b2_ref,
                     w3_ref, b3_ref,
                     out_ref, *, tanh_scale, lane_dense):
    """Fused double-Q MLP: both heads share one (width-packed) matmul chain."""
    obs = obs_ref[...]                     # bf16 [tile_b, obs_dim]
    act = act_ref[...]                     # bf16 [tile_b, act_dim]

    # Layer 1: the concat is folded into two partial matmuls.  [B, 2H], f32 acc.
    h = (jnp.dot(obs, w1o_ref[...], preferred_element_type=jnp.float32)
         + jnp.dot(act, w1a_ref[...], preferred_element_type=jnp.float32)
         + b1_ref[...])
    h = jnp.maximum(h, 0.0)                                       # ReLU (f32)

    # Layer 2: block-diagonal [2H, 2H] keeps the two heads independent.
    h = jnp.dot(h.astype(jnp.bfloat16), w2_ref[...],
                preferred_element_type=jnp.float32) + b2_ref[...]
    h = jnp.maximum(h, 0.0)                                       # ReLU (f32)

    # Layer 3: block-diagonal [2H, 2] -> column 0 is q1, column 1 is q2.
    q = jnp.dot(h.astype(jnp.bfloat16), w3_ref[...],
                preferred_element_type=jnp.float32) + b3_ref[...]

    # both=False path.  min FIRST, then tanh*scale on the single column:
    # exact because tanh is monotonic and 1/(1-gamma) > 0 (keep this invariant
    # if gamma handling ever changes).
    q_min = jnp.minimum(q[:, 0:1], q[:, 1:2])          # [tile_b, 1] f32

    if lane_dense:
        # Sublane->lane transpose rides the idle XLU; store becomes lane-dense.
        q_min = jnp.transpose(q_min)                   # [1, tile_b]

    if tanh_scale is not None:
        q_min = jnp.tanh(q_min) * tanh_scale

    out_ref[...] = q_min.reshape(out_ref.shape)


# ------------------------------- wrapper ----------------------------------- #
def _round_up(x, m):
    return (x + m - 1) // m * m


def double_q_critic_forward(obs, action, packed, *, use_tanh, gamma,
                            tile_b=4096):
    """Calls the fused Pallas kernel over a 1-D (parallel) batch grid."""
    assert obs.shape[0] == action.shape[0]
    B, obs_dim = obs.shape
    act_dim = action.shape[1]

    # Large tiles (per-step overhead dominates at this arithmetic intensity),
    # but cap at ceil(B/2) rounded to 8 so the grid has >= 2 parallel steps
    # whenever the batch allows it (lets v7x shard across its 2 TensorCores).
    half = _round_up((B + 1) // 2, 8)
    tile_b = max(8, min(_round_up(tile_b, 8), half))
    Bp = _round_up(B, tile_b)
    n_tiles = Bp // tile_b

    # Batch-sized inputs travel as bf16 (matmul operands are bf16 anyway).
    obs = obs.astype(jnp.bfloat16)
    action = action.astype(jnp.bfloat16)
    if Bp != B:
        obs = jnp.pad(obs, ((0, Bp - B), (0, 0)))
        action = jnp.pad(action, ((0, Bp - B), (0, 0)))

    # Lane-dense output only pays (and only differs from a masked store) once
    # the tile spans >= 128 lanes; tiny tiles keep the plain column layout.
    lane_dense = tile_b >= 128

    tanh_scale = (1.0 / (1.0 - gamma)) if use_tanh else None
    kernel = functools.partial(_double_q_kernel,
                               tanh_scale=tanh_scale, lane_dense=lane_dense)

    batch_spec = lambda shape: pl.BlockSpec(shape, lambda i: (i, 0))
    # Weights/biases: constant index_map -> VMEM-resident across grid steps;
    # ~13 KiB total, no double buffer needed.
    const_spec = lambda shape: pl.BlockSpec(shape, lambda i: (0,) * len(shape))

    in_specs = [
        batch_spec((tile_b, obs_dim)),
        batch_spec((tile_b, act_dim)),
    ] + [const_spec(p.shape) for p in packed]

    if lane_dense:
        out_spec = pl.BlockSpec((1, 1, tile_b), lambda i: (i, 0, 0))
        out_shape = jax.ShapeDtypeStruct((n_tiles, 1, tile_b), jnp.float32)
    else:
        out_spec = pl.BlockSpec((tile_b, 1), lambda i: (i, 0))
        out_shape = jax.ShapeDtypeStruct((Bp, 1), jnp.float32)

    out = pl.pallas_call(
        kernel,
        grid=(n_tiles,),
        in_specs=in_specs,
        out_specs=out_spec,
        out_shape=out_shape,
        compiler_params=pltpu.CompilerParams(
            dimension_semantics=("parallel",)),
    )(obs, action, *packed)

    if lane_dense:
        out = out.reshape(Bp, 1)
    return out[:B]


# -------------------------- deterministic params --------------------------- #
def _orthogonal(key, out_dim, in_dim):
    """Mimics nn.init.orthogonal_ on a PyTorch weight of shape [out, in]."""
    rows, cols = out_dim, in_dim
    a = jax.random.normal(key, (max(rows, cols), min(rows, cols)), jnp.float32)
    q, r = jnp.linalg.qr(a)
    q = q * jnp.sign(jnp.diag(r))          # make decomposition unique
    if rows < cols:
        q = q.T
    return q[:rows, :cols]                 # [out, in]


def make_heads(key, obs_dim, action_dim, hidden_dim):
    """Per-head params: Linear(in,h)/ReLU/Linear(h,h)/ReLU/Linear(h,1).

    Weights returned pre-transposed ([in, out]); biases as 2-D [1, out]
    (fill_(0.0), as in orthogonal_init_).  hidden_depth = 2.
    """
    in_dim = obs_dim + action_dim
    dims = [(hidden_dim, in_dim), (hidden_dim, hidden_dim), (1, hidden_dim)]

    def head(k):
        ks = jax.random.split(k, len(dims))
        plist = []
        for kk, (o, i) in zip(ks, dims):
            w = _orthogonal(kk, o, i).T                # [in, out]
            b = jnp.zeros((1, o), jnp.float32)
            plist += [w, b]
        return plist                                   # [w1,b1,w2,b2,w3,b3]

    k1, k2 = jax.random.split(key)
    return head(k1), head(k2)


def pack_params(head1, head2, obs_dim, hidden_dim, dtype=jnp.bfloat16):
    """Fuse the two heads into one packed matmul chain (done once, offline).

    To also fold a target critic / ensemble into the same launch, stack more
    head columns here (2H -> 128/256 lanes) instead of a second pallas_call.
    """
    w1_1, b1_1, w2_1, b2_1, w3_1, b3_1 = head1
    w1_2, b1_2, w2_2, b2_2, w3_2, b3_2 = head2
    H = hidden_dim

    w1 = jnp.concatenate([w1_1, w1_2], axis=1)               # [in, 2H]
    w1_obs = w1[:obs_dim].astype(dtype)                      # [obs_dim, 2H]
    w1_act = w1[obs_dim:].astype(dtype)                      # [act_dim, 2H]
    b1 = jnp.concatenate([b1_1, b1_2], axis=1)               # [1, 2H] f32

    w2 = jnp.zeros((2 * H, 2 * H), jnp.float32)
    w2 = w2.at[:H, :H].set(w2_1).at[H:, H:].set(w2_2)        # block-diag
    b2 = jnp.concatenate([b2_1, b2_2], axis=1)               # [1, 2H] f32

    w3 = jnp.zeros((2 * H, 2), jnp.float32)
    w3 = w3.at[:H, 0:1].set(w3_1).at[H:, 1:2].set(w3_2)      # block-diag
    b3 = jnp.concatenate([b3_1, b3_2], axis=1)               # [1, 2] f32

    return (w1_obs, w1_act, b1.astype(jnp.float32),
            w2.astype(dtype), b2.astype(jnp.float32),
            w3.astype(dtype), b3.astype(jnp.float32))


# ------------------------------ reference ---------------------------------- #
def double_q_reference(obs, action, head1, head2, *, use_tanh, gamma):
    """Pure-JAX reference mirroring the PyTorch op order (tanh per head, then
    min) with the kernel's bf16-matmul / f32-accumulate numerics."""
    x = jnp.concatenate([obs, action], axis=-1)

    def bdot(a, w):
        return jnp.dot(a.astype(jnp.bfloat16), w.astype(jnp.bfloat16),
                       preferred_element_type=jnp.float32)

    def mlp(p):
        w1, b1, w2, b2, w3, b3 = p
        h = jnp.maximum(bdot(x, w1) + b1, 0.0)
        h = jnp.maximum(bdot(h, w2) + b2, 0.0)
        return bdot(h, w3) + b3

    q1, q2 = mlp(head1), mlp(head2)
    if use_tanh:
        s = 1.0 / (1.0 - gamma)
        q1, q2 = jnp.tanh(q1) * s, jnp.tanh(q2) * s
    return jnp.minimum(q1, q2)


# ---------------------------------- main ----------------------------------- #
if __name__ == "__main__":
    # Small shapes consistent with the module: hidden_depth=2, hidden_dim=32.
    B, OBS_DIM, ACT_DIM, HIDDEN = 128, 24, 8, 32
    GAMMA, USE_TANH = 0.99, True

    root = jax.random.PRNGKey(0)
    k_obs, k_act, k_par = jax.random.split(root, 3)
    obs = jax.random.normal(k_obs, (B, OBS_DIM), jnp.float32)
    action = jax.random.normal(k_act, (B, ACT_DIM), jnp.float32)

    head1, head2 = make_heads(k_par, OBS_DIM, ACT_DIM, HIDDEN)
    packed = pack_params(head1, head2, OBS_DIM, HIDDEN)

    q_min = double_q_critic_forward(obs, action, packed,
                                    use_tanh=USE_TANH, gamma=GAMMA)
    jax.block_until_ready(q_min)

    # sanity: shape [B, 1], finite values, tight match vs. reference
    assert q_min.shape == (B, 1)
    assert bool(jnp.all(jnp.isfinite(q_min)))
    q_ref = double_q_reference(obs, action, head1, head2,
                               use_tanh=USE_TANH, gamma=GAMMA)
    scale = (1.0 / (1.0 - GAMMA)) if USE_TANH else 1.0
    max_err = float(jnp.max(jnp.abs(q_min - q_ref)))
    assert max_err <= 1e-2 * scale + 1e-2, f"max abs err {max_err}"

    # TODO(synk): grad_pen (autograd gradient penalty) is a training-time
    # utility outside the forward pass; not implemented as a kernel.
    print("KERNEL_OK")
</pallas_src>

<mosaic_0001>
module attributes {stable_mosaic.version = 11 : i64} {
  func.func @_double_q_kernel(%arg0: i32, %arg1: memref<64x24xbf16, #tpu.memory_space<vmem>>, %arg2: memref<64x8xbf16, #tpu.memory_space<vmem>>, %arg3: memref<24x64xbf16, #tpu.memory_space<vmem>>, %arg4: memref<8x64xbf16, #tpu.memory_space<vmem>>, %arg5: memref<1x64xf32, #tpu.memory_space<vmem>>, %arg6: memref<64x64xbf16, #tpu.memory_space<vmem>>, %arg7: memref<1x64xf32, #tpu.memory_space<vmem>>, %arg8: memref<64x2xbf16, #tpu.memory_space<vmem>>, %arg9: memref<1x2xf32, #tpu.memory_space<vmem>>, %arg10: memref<64x1xf32, #tpu.memory_space<vmem>>) attributes {dimension_semantics = [#tpu.dimension_semantics<parallel>], iteration_bounds = array<i64: 2>, scalar_prefetch = 0 : i64, scratch_operands = 0 : i64, tpu.core_type = #tpu.core_type<tc>, window_params = [{transform_indices = @transform_0, window_bounds = array<i64: 64, 24>}, {transform_indices = @transform_1, window_bounds = array<i64: 64, 8>}, {pipeline_mode = #tpu.pipeline_mode<synchronous>, transform_indices = @transform_2, window_bounds = array<i64: 24, 64>}, {pipeline_mode = #tpu.pipeline_mode<synchronous>, transform_indices = @transform_3, window_bounds = array<i64: 8, 64>}, {pipeline_mode = #tpu.pipeline_mode<synchronous>, transform_indices = @transform_4, window_bounds = array<i64: 1, 64>}, {pipeline_mode = #tpu.pipeline_mode<synchronous>, transform_indices = @transform_5, window_bounds = array<i64: 64, 64>}, {pipeline_mode = #tpu.pipeline_mode<synchronous>, transform_indices = @transform_6, window_bounds = array<i64: 1, 64>}, {pipeline_mode = #tpu.pipeline_mode<synchronous>, transform_indices = @transform_7, window_bounds = array<i64: 64, 2>}, {pipeline_mode = #tpu.pipeline_mode<synchronous>, transform_indices = @transform_8, window_bounds = array<i64: 1, 2>}, {transform_indices = @transform_9, window_bounds = array<i64: 64, 1>}]} {
    %c0 = arith.constant 0 : index
    %c0_0 = arith.constant 0 : index
    %0 = vector.load %arg1[%c0, %c0_0] : memref<64x24xbf16, #tpu.memory_space<vmem>>, vector<64x24xbf16>
    %c0_1 = arith.constant 0 : index
    %c0_2 = arith.constant 0 : index
    %1 = vector.load %arg2[%c0_1, %c0_2] : memref<64x8xbf16, #tpu.memory_space<vmem>>, vector<64x8xbf16>
    %c0_3 = arith.constant 0 : index
    %c0_4 = arith.constant 0 : index
    %2 = vector.load %arg3[%c0_3, %c0_4] : memref<24x64xbf16, #tpu.memory_space<vmem>>, vector<24x64xbf16>
    %cst = arith.constant dense<0.000000e+00> : vector<64x64xf32>
    %3 = tpu.matmul %0, %2, %cst {dimension_numbers = #tpu.dot_dimension_numbers<[1], [0], [0], [1], [0, 0, 1, 1], [], []>} : vector<64x24xbf16>, vector<24x64xbf16>, vector<64x64xf32> -> vector<64x64xf32>
    %c0_5 = arith.constant 0 : index
    %c0_6 = arith.constant 0 : index
    %4 = vector.load %arg4[%c0_5, %c0_6] : memref<8x64xbf16, #tpu.memory_space<vmem>>, vector<8x64xbf16>
    %cst_7 = arith.constant dense<0.000000e+00> : vector<64x64xf32>
    %5 = tpu.matmul %1, %4, %cst_7 {dimension_numbers = #tpu.dot_dimension_numbers<[1], [0], [0], [1], [0, 0, 1, 1], [], []>} : vector<64x8xbf16>, vector<8x64xbf16>, vector<64x64xf32> -> vector<64x64xf32>
    %6 = arith.addf %3, %5 : vector<64x64xf32>
    %c0_8 = arith.constant 0 : index
    %c0_9 = arith.constant 0 : index
    %7 = vector.load %arg5[%c0_8, %c0_9] : memref<1x64xf32, #tpu.memory_space<vmem>>, vector<1x64xf32>
    %8 = vector.broadcast %7 : vector<1x64xf32> to vector<64x64xf32>
    %9 = arith.addf %6, %8 : vector<64x64xf32>
    %cst_10 = arith.constant 0.000000e+00 : f32
    %10 = vector.broadcast %cst_10 : f32 to vector<64x64xf32>
    %11 = arith.maximumf %9, %10 : vector<64x64xf32>
    %12 = arith.truncf %11 : vector<64x64xf32> to vector<64x64xbf16>
    %c0_11 = arith.constant 0 : index
    %c0_12 = arith.constant 0 : index
    %13 = vector.load %arg6[%c0_11, %c0_12] : memref<64x64xbf16, #tpu.memory_space<vmem>>, vector<64x64xbf16>
    %cst_13 = arith.constant dense<0.000000e+00> : vector<64x64xf32>
    %14 = tpu.matmul %12, %13, %cst_13 {dimension_numbers = #tpu.dot_dimension_numbers<[1], [0], [0], [1], [0, 0, 1, 1], [], []>} : vector<64x64xbf16>, vector<64x64xbf16>, vector<64x64xf32> -> vector<64x64xf32>
    %c0_14 = arith.constant 0 : index
    %c0_15 = arith.constant 0 : index
    %15 = vector.load %arg7[%c0_14, %c0_15] : memref<1x64xf32, #tpu.memory_space<vmem>>, vector<1x64xf32>
    %16 = vector.broadcast %15 : vector<1x64xf32> to vector<64x64xf32>
    %17 = arith.addf %14, %16 : vector<64x64xf32>
    %cst_16 = arith.constant 0.000000e+00 : f32
    %18 = vector.broadcast %cst_16 : f32 to vector<64x64xf32>
    %19 = arith.maximumf %17, %18 : vector<64x64xf32>
    %20 = arith.truncf %19 : vector<64x64xf32> to vector<64x64xbf16>
    %c0_17 = arith.constant 0 : index
    %c0_18 = arith.constant 0 : index
    %21 = vector.load %arg8[%c0_17, %c0_18] : memref<64x2xbf16, #tpu.memory_space<vmem>>, vector<64x2xbf16>
    %cst_19 = arith.constant dense<0.000000e+00> : vector<64x2xf32>
    %22 = tpu.matmul %20, %21, %cst_19 {dimension_numbers = #tpu.dot_dimension_numbers<[1], [0], [0], [1], [0, 0, 1, 1], [], []>} : vector<64x64xbf16>, vector<64x2xbf16>, vector<64x2xf32> -> vector<64x2xf32>
    %c0_20 = arith.constant 0 : index
    %c0_21 = arith.constant 0 : index
    %23 = vector.load %arg9[%c0_20, %c0_21] : memref<1x2xf32, #tpu.memory_space<vmem>>, vector<1x2xf32>
    %24 = vector.broadcast %23 : vector<1x2xf32> to vector<64x2xf32>
    %25 = arith.addf %22, %24 : vector<64x2xf32>
    %26 = vector.extract_strided_slice %25 {offsets = [0, 0], sizes = [64, 1], strides = [1, 1]} : vector<64x2xf32> to vector<64x1xf32>
    %27 = vector.extract_strided_slice %25 {offsets = [0, 1], sizes = [64, 1], strides = [1, 1]} : vector<64x2xf32> to vector<64x1xf32>
    %28 = arith.minimumf %26, %27 : vector<64x1xf32>
    %29 = math.tanh %28 : vector<64x1xf32>
    %cst_22 = arith.constant 1.000000e+02 : f32
    %30 = vector.broadcast %cst_22 : f32 to vector<64x1xf32>
    %31 = arith.mulf %29, %30 : vector<64x1xf32>
    %c0_23 = arith.constant 0 : index
    %c0_24 = arith.constant 0 : index
    %32 = vector.load %arg10[%c0_23, %c0_24] : memref<64x1xf32, #tpu.memory_space<vmem>>, vector<64x1xf32>
    tpu.vector_store %arg10[%c0_23, %c0_24], %31 {strides = array<i32>} : memref<64x1xf32, #tpu.memory_space<vmem>>, vector<64x1xf32>,
    return
  }
  func.func @transform_0(%arg0: i32) -> (i32, i32) {
    %c0_i32 = arith.constant 0 : i32
    %c0_i32_0 = arith.constant 0 : i32
    return %arg0, %c0_i32 : i32, i32
  }
  func.func @transform_1(%arg0: i32) -> (i32, i32) {
    %c0_i32 = arith.constant 0 : i32
    %c0_i32_0 = arith.constant 0 : i32
    return %arg0, %c0_i32 : i32, i32
  }
  func.func @transform_2(%arg0: i32) -> (i32, i32) {
    %c0_i32 = arith.constant 0 : i32
    %c0_i32_0 = arith.constant 0 : i32
    %c0_i32_1 = arith.constant 0 : i32
    return %c0_i32, %c0_i32_0 : i32, i32
  }
  func.func @transform_3(%arg0: i32) -> (i32, i32) {
    %c0_i32 = arith.constant 0 : i32
    %c0_i32_0 = arith.constant 0 : i32
    %c0_i32_1 = arith.constant 0 : i32
    return %c0_i32, %c0_i32_0 : i32, i32
  }
  func.func @transform_4(%arg0: i32) -> (i32, i32) {
    %c0_i32 = arith.constant 0 : i32
    %c0_i32_0 = arith.constant 0 : i32
    %c0_i32_1 = arith.constant 0 : i32
    return %c0_i32, %c0_i32_0 : i32, i32
  }
  func.func @transform_5(%arg0: i32) -> (i32, i32) {
    %c0_i32 = arith.constant 0 : i32
    %c0_i32_0 = arith.constant 0 : i32
    %c0_i32_1 = arith.constant 0 : i32
    return %c0_i32, %c0_i32_0 : i32, i32
  }
  func.func @transform_6(%arg0: i32) -> (i32, i32) {
    %c0_i32 = arith.constant 0 : i32
    %c0_i32_0 = arith.constant 0 : i32
    %c0_i32_1 = arith.constant 0 : i32
    return %c0_i32, %c0_i32_0 : i32, i32
  }
  func.func @transform_7(%arg0: i32) -> (i32, i32) {
    %c0_i32 = arith.constant 0 : i32
    %c0_i32_0 = arith.constant 0 : i32
    %c0_i32_1 = arith.constant 0 : i32
    return %c0_i32, %c0_i32_0 : i32, i32
  }
  func.func @transform_8(%arg0: i32) -> (i32, i32) {
    %c0_i32 = arith.constant 0 : i32
    %c0_i32_0 = arith.constant 0 : i32
    %c0_i32_1 = arith.constant 0 : i32
    return %c0_i32, %c0_i32_0 : i32, i32
  }
  func.func @transform_9(%arg0: i32) -> (i32, i32) {
    %c0_i32 = arith.constant 0 : i32
    %c0_i32_0 = arith.constant 0 : i32
    return %arg0, %c0_i32 : i32, i32
  }
}

</mosaic_0001>

<bundles_post_ra>
// kernel: tpu_custom_call.1
= control target key start
LH: loop header
LB: loop body
LE: loop exit
PB: predicated region body
PF: predicated region fallthrough
CT: control target
= control target key end

     0   :  { %s1247_s30 = smov 0   ;;  %s1347_s0 = inlined_call_operand.vmem [shape: bf16[128,24], index: 0, kind: input, shape index: {}]   ;;  %s1348_s1 = inlined_call_operand.vmem [shape: bf16[128,8], index: 1, kind: input, shape index: {}]   ;;  %s1349_s2 = inlined_call_operand.vmem [shape: bf16[24,64], index: 2, kind: input, shape index: {}]   ;;  %s1350_s3 = inlined_call_operand.vmem [shape: bf16[8,64], index: 3, kind: input, shape index: {}]   ;;  %s1351_s4 = inlined_call_operand.vmem [shape: f32[1,64], index: 4, kind: input, shape index: {}]   ;;  %s1352_s5 = inlined_call_operand.vmem [shape: bf16[64,64], index: 5, kind: input, shape index: {}]   ;;  %s1353_s6 = inlined_call_operand.vmem [shape: f32[1,64], index: 6, kind: input, shape index: {}]   ;;  %s1354_s7 = inlined_call_operand.vmem [shape: bf16[64,2], index: 7, kind: input, shape index: {}]   ;;  %s1355_s8 = inlined_call_operand.vmem [shape: f32[1,2], index: 8, kind: input, shape index: {}]   ;;  %s1356_s9 = inlined_call_operand.vmem [shape: f32[128,1], index: 9, kind: output, shape index: {}]  }
   0x1 LB: > { %s996_s10 = sadd.s32 4294967295, %s1194_s30   ;;  %p1000_p0 = scmp.ge.s32.totalorder %s1194_s30, 1  ;;  %s1194_s30 = sphi %s1247_s30, %s19_s30  }
   0x2   : > { %p299_p1 = scmp.lt.s32.totalorder %s1194_s30, 3 }
   0x4   : > { %p300_p2 = pnand %p1000_p0, %p299_p1 }
   0x5   : > { %v378_v0 = vld [vmem:[%s1350_s3] sm:$0xf] (!%p300_p2)  ;;  %vm412_vm0 = vcmask (!%p300_p2), 1043456   ;;  %s1001_s13 = sshll.u32 (!%p300_p2), %s996_s10, 3  ;;  %v1165_v4 = vld [vmem:[%s1352_s5 + $0x8] sm:$0xff] (!%p300_p2)   ;;  %vm399_vm1 = vcmask (!%p300_p2), 64512  }
   0x6   : > { %303 = sbr.rel (%p300_p2) target bundleno = 838 (0x346), region = 56  ;;  %v1155_v1 = vld [vmem:[%s1349_s2] sm:$0xff] (!%p300_p2)   ;;  %1143 = vmatprep.subr.msk.bf16.mxu0 (!%p300_p2), %vm412_vm0, %v378_v0  ;;  %v414_v2 = vsel (!%p300_p2), %vm412_vm0, %v378_v0, 0  ;;  %p341_p3 = scmp.lt.s32.totalorder (!%p300_p2), %s1001_s13, 15  ;;  %v1158_v5 = vld [vmem:[%s1349_s2 + $0x8] ss:$0 sps:$4 sm:$0xff] (!%p300_p2)  }
   0x7   : > { %1074 = vmatpush3.bf16.msra.mxu0 (!%p300_p2), %v414_v2  ;;  %v1164_v3 = vld [vmem:[%s1352_s5] sm:$0xff] (!%p300_p2)   ;;  %v524_v9 = vsel (!%p300_p2), %vm412_vm0, %v1158_v5, 0  ;;  %vm510_vm2 = vcmask (!%p300_p2), 195584   ;;  %v1166_v15 = vld [vmem:[%s1352_s5 + $0x10] sm:$0xff] (!%p300_p2)   ;;  %v1167_v16 = vld [vmem:[%s1352_s5 + $0x18] sm:$0xff] (!%p300_p2)   ;;  %vm657_vm3 = vcmask (!%p300_p2), 523264  }
   0x8   : > { %1083 = vmatprep.subr.bf16.mxu0 (!%p300_p2), %v1155_v1  ;;  %1095 = vmatprep.subr.bf16.mxu1 (!%p300_p2), %v1164_v3  ;;  %v1168_v17 = vld [vmem:[%s1354_s7] sm:$0xff] (!%p300_p2)   ;;  %v1169_v18 = vld [vmem:[%s1354_s7 + $0x8] sm:$0xff] (!%p300_p2)   ;;  %v1170_v48 = vld [vmem:[%s1354_s7 + $0x10] sm:$0xff] (!%p300_p2)   ;;  %vm919_vm4 = vcmask (!%p300_p2), 7168  }
   0x9   : > { %1096 = vmatpush3.bf16.msra.mxu1 (!%p300_p2), %v1164_v3  ;;  %v1025_v19 = vld [vmem:[%s1351_s4] ss:$0 sm:$0xff] (!%p300_p2)  ;;  %v1171_v49 = vld [vmem:[%s1354_s7 + $0x18] sm:$0xff] (!%p300_p2)  }
   0xa   : > { %1097 = vmatprep.subr.bf16.mxu1 (!%p300_p2), %v1165_v4  ;;  %v1026_v50 = vld [vmem:[%s1353_s6] ss:$0 sm:$0xff] (!%p300_p2) }
   0xd   : > { %s1358_s13 = smov (!%p341_p3, %s1001_s13), 15  ;;  %1098 = vmatpush3.bf16.msra.mxu1 %v1165_v4 }
   0xe   : > { %s1002_s20 = sshll.u32 %s1358_s13, 2  ;;  %1099 = vmatprep.subr.bf16.mxu1 %v1166_v15  ;;  %s1006_s29 = sshll.u32 %s1358_s13, 3 }
   0xf   : > { %s350_s23 = scalar_lea.vmem %s1348_s1, %s1002_s20  ;;  %s344_s28 = scalar_lea.vmem %s1347_s0, %s1002_s20 }
  0x10   : > { %v1154_v6 = vld [vmem:[%s350_s23] sm:$0xff]   ;;  %v1156_v7 = vld [vmem:[%s350_s23 + $0x8] sm:$0xff]   ;;  %v1157_v8 = vld [vmem:[%s350_s23 + $0x10] sm:$0xff]   ;;  %s1326_s12 = scalar_lea.vmem %s1356_s9, %s1006_s29 }
  0x11   : > { %1075 = vmatprep.mubr.msk.bf16.mxu0 %vm399_vm1, %v1154_v6  ;;  %v1159_v10 = vld [vmem:[%s350_s23 + $0x18] sm:$0xff]   ;;  %v1160_v11 = vld [vmem:[%s344_s28] sm:$0xff]   ;;  %v1161_v12 = vld [vmem:[%s344_s28 + $0x8] sm:$0xff]   ;;  %1100 = vmatpush3.bf16.msra.mxu1 %v1166_v15 }
  0x12   : > { %1076 = vmatmul.mubr.msk.bf16.vlgmr.msra.gmra.mrb[0].mxu0 %vm399_vm1, %v1156_v7  ;;  %v1162_v13 = vld [vmem:[%s344_s28 + $0x10] sm:$0xff]   ;;  %v1163_v14 = vld [vmem:[%s344_s28 + $0x18] sm:$0xff]   ;;  %1101 = vmatprep.subr.bf16.mxu1 %v1167_v16  ;;  %v1035_v15 = vld [vmem:[%s1355_s8] ss:$0 sm:$0xff]  ;;  %s1196_s28 = smov 127  }
  0x13   : > { %1084 = vmatpush3.bf16.msra.mxu0 %v1155_v1  ;;  %1079 = vmatprep.mubr.msk.bf16.mxu0 %vm399_vm1, %v1157_v8 }
  0x14   : > { %1144 = vmatprep.subr.msk.bf16.mxu0 %vm412_vm0, %v1158_v5 }
  0x15   : > { %1102 = vmatpush3.bf16.msra.mxu1 %v1167_v16 }
  0x16   : > { %1127 = vmatprep.subr.bf16.mxu1 %v1168_v17 }
  0x17   : > { %1086 = vmatpush3.bf16.msra.mxu0 %v524_v9 }
  0x18   : > { %1111 = vmatprep.subr.bf16.mxu0 %v1168_v17 }
  0x1a   : > { %1080 = vmatmul.mubr.msk.bf16.gmra.mrb[4].mxu0 %vm399_vm1, %v1159_v10 }
  0x1b   : > { %1087 = vmatprep.mubr.msk.bf16.mxu0 %vm510_vm2, %v1160_v11 }
  0x22   : > { %1088 = vmatmul.mubr.msk.bf16.vlgmr.msra.gmra.mrb[0].mxu0 %vm510_vm2, %v1161_v12 }
  0x23   : > { %1091 = vmatprep.mubr.msk.bf16.mxu0 %vm510_vm2, %v1162_v13  ;;  %1112 = vmatpush3.bf16.msra.mxu0 %v1168_v17 }
  0x24   : > { %1113 = vmatprep.subr.bf16.mxu0 %v1169_v18 }
  0x27   : > { %1114 = vmatpush3.bf16.msra.mxu0 %v1169_v18 }
  0x28   : > { %1115 = vmatprep.subr.bf16.mxu0 %v1170_v48 }
  0x2a   : > { %1092 = vmatmul.mubr.msk.bf16.gmra.mrb[4].mxu0 %vm510_vm2, %v1163_v14 }
  0x2b   : > { %1116 = vmatpush3.bf16.msra.mxu0 %v1170_v48 }
  0x2c   : > { %1117 = vmatprep.subr.bf16.mxu0 %v1171_v49 }
  0x2f   : > { %1118 = vmatpush3.bf16.msra.mxu0 %v1171_v49 }
  0xf5   : > { %v1089_v20 = vpop.f32.mrb[0].mxu0 }
  0xf6   : > { %v600_v21 = vadd.f32 %v1089_v20, %v1025_v19  ;;  %v560_v22 = vpop.f32.mrb[1].mxu0 }
  0xf7   : > { %v598_v23 = vadd.f32 %v1025_v19, %v560_v22  ;;  %v1090_v24 = vpop.f32.mrb[2].mxu0 }
  0xf8   : > { %v601_v25 = vadd.f32 %v1090_v24, %v1025_v19  ;;  %v563_v26 = vpop.f32.mrb[3].mxu0  ;;  %v608_v28 = vmax.f32 %v600_v21, 0.0 }
  0xf9   : > { %v599_v27 = vadd.f32 %v1025_v19, %v563_v26  ;;  %v606_v30 = vmax.f32 %v598_v23, 0.0 }
  0xfa   : > { %v609_v29 = vmax.f32 %v601_v25, 0.0 }
  0xfb   : > { %v607_v31 = vmax.f32 %v599_v27, 0.0 }
  0xfc   : > { %v615_v32 = vpack.c.bf16 %v609_v29, %v608_v28 }
  0xfd   : > { %v1093_v33 = vpop.f32.mrb[4].mxu0  ;;  %v614_v34 = vpack.c.bf16 %v607_v31, %v606_v30 }
  0xfe   : > { %v604_v35 = vadd.f32 %v1093_v33, %v1025_v19  ;;  %v576_v36 = vpop.f32.mrb[5].mxu0 }
  0xff   : > { %v602_v37 = vadd.f32 %v1025_v19, %v576_v36  ;;  %v1094_v38 = vpop.f32.mrb[6].mxu0  ;;  %1103 = vmatprep.mubr.msk.bf16.mxu1 %vm657_vm3, %v614_v34 }
 0x100   : > { %v605_v39 = vadd.f32 %v1094_v38, %v1025_v19  ;;  %v579_v40 = vpop.f32.mrb[7].mxu0  ;;  %1104 = vmatmul.mubr.msk.bf16.vlgmr.msra.gmra.mrb[0].mxu1 %vm657_vm3, %v615_v32  ;;  %v612_v42 = vmax.f32 %v604_v35, 0.0 }
 0x101   : > { %v603_v41 = vadd.f32 %v1025_v19, %v579_v40  ;;  %1131 = vmatpush3.bf16.msra.mxu1 %v1168_v17  ;;  %v610_v44 = vmax.f32 %v602_v37, 0.0 }
 0x102   : > { %v613_v43 = vmax.f32 %v605_v39, 0.0  ;;  %1128 = vmatprep.subr.bf16.mxu1 %v1169_v18 }
 0x103   : > { %v611_v45 = vmax.f32 %v603_v41, 0.0 }
 0x104   : > { %v617_v46 = vpack.c.bf16 %v613_v43, %v612_v42 }
 0x105   : > { %v616_v47 = vpack.c.bf16 %v611_v45, %v610_v44  ;;  %1132 = vmatpush3.bf16.msra.mxu1 %v1169_v18 }
 0x106   : > { %1129 = vmatprep.subr.bf16.mxu1 %v1170_v48 }
 0x107   : > { %1107 = vmatprep.mubr.msk.bf16.mxu1 %vm657_vm3, %v616_v47 }
 0x108   : > { %1108 = vmatmul.mubr.msk.bf16.gmra.mrb[4].mxu1 %vm657_vm3, %v617_v46 }
 0x109   : > { %1133 = vmatpush3.bf16.msra.mxu1 %v1170_v48 }
 0x10a   : > { %1130 = vmatprep.subr.bf16.mxu1 %v1171_v49 }
 0x10d   : > { %1134 = vmatpush3.bf16.msra.mxu1 %v1171_v49 }
 0x1d3   : > { %v1105_v51 = vpop.f32.mrb[0].mxu1 }
 0x1d4   : > { %v713_v52 = vadd.f32 %v1105_v51, %v1026_v50  ;;  %v704_v53 = vpop.f32.mrb[1].mxu1 }
 0x1d5   : > { %v705_v54 = vadd.f32 %v1026_v50, %v704_v53  ;;  %v1106_v55 = vpop.f32.mrb[2].mxu1 }
 0x1d6   : > { %v716_v56 = vadd.f32 %v1106_v55, %v1026_v50  ;;  %v707_v57 = vpop.f32.mrb[3].mxu1  ;;  %v737_v59 = vmax.f32 %v713_v52, 0.0 }
 0x1d7   : > { %v708_v58 = vadd.f32 %v1026_v50, %v707_v57  ;;  %v735_v61 = vmax.f32 %v705_v54, 0.0 }
 0x1d8   : > { %v738_v60 = vmax.f32 %v716_v56, 0.0 }
 0x1d9   : > { %v736_v62 = vmax.f32 %v708_v58, 0.0 }
 0x1da   : > { %v744_v63 = vpack.c.bf16 %v738_v60, %v737_v59 }
 0x1db   : > { %v743_v0 = vpack.c.bf16 %v736_v62, %v735_v61  ;;  %v1109_v1 = vpop.f32.mrb[4].mxu1 }
 0x1dc   : > { %v729_v2 = vadd.f32 %v1109_v1, %v1026_v50  ;;  %v720_v3 = vpop.f32.mrb[5].mxu1 }
 0x1dd   : > { %v721_v4 = vadd.f32 %v1026_v50, %v720_v3  ;;  %v1110_v5 = vpop.f32.mrb[6].mxu1  ;;  %1119 = vmatprep.mubr.msk.bf16.mxu0 %vm657_vm3, %v743_v0 }
 0x1de   : > { %v732_v6 = vadd.f32 %v1110_v5, %v1026_v50  ;;  %v723_v7 = vpop.f32.mrb[7].mxu1  ;;  %1120 = vmatmul.mubr.msk.bf16.vlgmr.msra.gmra.mrb[8].mxu0 %vm657_vm3, %v744_v63  ;;  %v741_v9 = vmax.f32 %v729_v2, 0.0 }
 0x1df   : > { %v724_v8 = vadd.f32 %v1026_v50, %v723_v7  ;;  %v739_v11 = vmax.f32 %v721_v4, 0.0 }
 0x1e0   : > { %v742_v10 = vmax.f32 %v732_v6, 0.0 }
 0x1e1   : > { %v740_v12 = vmax.f32 %v724_v8, 0.0 }
 0x1e2   : > { %v746_v13 = vpack.c.bf16 %v742_v10, %v741_v9 }
 0x1e3   : > { %v745_v14 = vpack.c.bf16 %v740_v12, %v739_v11 }
 0x1e5   : > { %1123 = vmatprep.mubr.msk.bf16.mxu1 %vm657_vm3, %v745_v14 }
 0x1e6   : > { %1124 = vmatmul.mubr.msk.bf16.vlgmr.msra.gmra.mrb[8].mxu1 %vm657_vm3, %v746_v13 }
 0x2b1   : > { %v1121_v16 = vpop.f32.mrb[8].mxu0 }
 0x2b2   : > { %v841_v17 = vadd.f32 %v1121_v16, %v1035_v15  ;;  %v832_v18 = vpop.f32.mrb[9].mxu0 }
 0x2b3   : > { %v833_v19 = vadd.f32 %v1035_v15, %v832_v18  ;;  %v1122_v20 = vpop.f32.mrb[10].mxu0 }
 0x2b4   : > { %875 = vrot.lane.b32.xlu1 %v841_v17, %s1196_s28  ;;  %v835_v21 = vpop.f32.mrb[11].mxu0  ;;  %v844_v22 = vadd.f32 %v1122_v20, %v1035_v15 }
 0x2b5   : > { %871 = vrot.lane.b32.xlu0 %v833_v19, %s1196_s28  ;;  %v836_v23 = vadd.f32 %v1035_v15, %v835_v21 }
 0x2b8   : > { %877 = vrot.lane.b32.xlu1 %v844_v22, %s1196_s28 }
 0x2b9   : > { %873 = vrot.lane.b32.xlu0 %v836_v23, %s1196_s28  ;;  %v1125_v24 = vpop.f32.mrb[8].mxu1 }
 0x2ba   : > { %v848_v25 = vpop.f32.mrb[9].mxu1  ;;  %v857_v30 = vadd.f32 %v1125_v24, %v1035_v15 }
 0x2bb   : > { %v849_v26 = vadd.f32 %v1035_v15, %v848_v25  ;;  %v1126_v27 = vpop.f32.mrb[10].mxu1 }
 0x2bc   : > { %v851_v28 = vpop.f32.mrb[11].mxu1  ;;  %v860_v31 = vadd.f32 %v1126_v27, %v1035_v15 }
 0x2bd   : > { %v852_v29 = vadd.f32 %v1035_v15, %v851_v28  ;;  %879 = vrot.lane.b32.xlu0 %v849_v26, %s1196_s28 }
 0x2bf   : > { %881 = vrot.lane.b32.xlu1 %v852_v29, %s1196_s28 }
 0x2c1   : > { %883 = vrot.lane.b32.xlu0 %v857_v30, %s1196_s28 }
 0x2c3   : > { %885 = vrot.lane.b32.xlu1 %v860_v31, %s1196_s28 }
 0x326   : > { %v876_v32 = vpop.permute.xlu1 %875 }
 0x327   : > { %v897_v33 = vmin.f32 %v841_v17, %v876_v32  ;;  %v872_v34 = vpop.permute.xlu0 %871 }
 0x328   : > { %v895_v35 = vmin.f32 %v833_v19, %v872_v34 }
 0x329   : > { %1172 = vtanh.f32 %v897_v33 }
 0x32a   : > { %1174 = vtanh.f32 %v895_v35  ;;  %v878_v36 = vpop.permute.xlu1 %877 }
 0x32b   : > { %v898_v37 = vmin.f32 %v844_v22, %v878_v36  ;;  %v874_v38 = vpop.permute.xlu0 %873 }
 0x32c   : > { %v896_v39 = vmin.f32 %v836_v23, %v874_v38 }
 0x32d   : > { %1176 = vtanh.f32 %v898_v37 }
 0x32e   : > { %1178 = vtanh.f32 %v896_v39 }
 0x32f   : > { %v880_v40 = vpop.permute.xlu0 %879 }
 0x330   : > { %v899_v41 = vmin.f32 %v849_v26, %v880_v40 }
 0x331   : > { %v882_v42 = vpop.permute.xlu1 %881 }
 0x332   : > { %1180 = vtanh.f32 %v899_v41  ;;  %v900_v43 = vmin.f32 %v852_v29, %v882_v42 }
 0x333   : > { %v1173_v44 = vpop.eup %1172  ;;  %v884_v45 = vpop.permute.xlu0 %883 }
 0x334   : > { %v1175_v46 = vpop.eup %1174  ;;  %v913_v47 = vmul.f32 100.0, %v1173_v44  ;;  %1182 = vtanh.f32 %v900_v43  ;;  %v901_v48 = vmin.f32 %v857_v30, %v884_v45 }
 0x335   : > { %v911_v49 = vmul.f32 100.0, %v1175_v46  ;;  %v886_v50 = vpop.permute.xlu1 %885 }
 0x336   : > { %922 = vst.msk [vmem:[%s1326_s12 + $0x10] sm:$0xff] %vm919_vm4, %v913_v47  ;;  %1184 = vtanh.f32 %v901_v48  ;;  %v902_v51 = vmin.f32 %v860_v31, %v886_v50 }
 0x337   : > { %v1177_v52 = vpop.eup %1176  ;;  %920 = vst.msk [vmem:[%s1326_s12] sm:$0xff] %vm919_vm4, %v911_v49 }
 0x338   : > { %v1179_v53 = vpop.eup %1178  ;;  %v914_v54 = vmul.f32 100.0, %v1177_v52  ;;  %1186 = vtanh.f32 %v902_v51 }
 0x339   : > { %v912_v55 = vmul.f32 100.0, %v1179_v53 }
 0x33a   : > { %923 = vst.msk [vmem:[%s1326_s12 + $0x18] sm:$0xff] %vm919_vm4, %v914_v54 }
 0x33b   : > { %921 = vst.msk [vmem:[%s1326_s12 + $0x8] sm:$0xff] %vm919_vm4, %v912_v55 }
 0x33c   : > { %v1181_v56 = vpop.eup %1180 }
 0x33d   : > { %v915_v57 = vmul.f32 100.0, %v1181_v56 }
 0x33e   : > { %v1183_v58 = vpop.eup %1182 }
 0x33f   : > { %924 = vst.msk [vmem:[%s1326_s12 + $0x20] sm:$0xff] %vm919_vm4, %v915_v57  ;;  %v916_v59 = vmul.f32 100.0, %v1183_v58 }
 0x340   : > { %v1185_v60 = vpop.eup %1184 }
 0x341   : > { %925 = vst.msk [vmem:[%s1326_s12 + $0x28] sm:$0xff] %vm919_vm4, %v916_v59  ;;  %v917_v61 = vmul.f32 100.0, %v1185_v60 }
 0x342   : > { %v1187_v62 = vpop.eup %1186 }
 0x343   : > { %926 = vst.msk [vmem:[%s1326_s12 + $0x30] sm:$0xff] %vm919_vm4, %v917_v61  ;;  %v918_v63 = vmul.f32 100.0, %v1187_v62 }
 0x345   : > { %927 = vst.msk [vmem:[%s1326_s12 + $0x38] sm:$0xff] %vm919_vm4, %v918_v63 }
 0x346 PF: > { %s19_s30 = sadd.s32 1, %s1194_s30  }
 0x347   : > { %p16_p4 = scmp.ge.s32.totalorder %s19_s30, 4  }
 0x349   :  { %18 = sbr.rel (!%p16_p4) target bundleno = 1 (0x1), region = 89 }

</bundles_post_ra>
